<compile_context>
chip_gen: v5e
topology: v5e:2x2
jax: 0.10.0
libtpu: 0.0.40
codegen_flags: <defaults>
</compile_context>

<pallas_src>
import jax
import jax.numpy as jnp
from jax.experimental import pallas as pl
from jax.experimental.pallas import tpu as pltpu


def _round_up(v, m):
    return ((v + m - 1) // m) * m


def _split_dims(in_dim, out_dim):
    """Mirror of PESymetryMeanDivided.__init__ dim split."""
    if in_dim * 2 < out_dim:
        return out_dim - in_dim, in_dim          # ind_dim, pool_dim
    elif in_dim < out_dim:
        return in_dim, out_dim - in_dim
    else:
        pool_dim = out_dim // 2
        return out_dim - pool_dim, pool_dim


# ---------------------------------------------------------------------------
# Kernel: one fused affine map per batch block (MXU matmul + bias add).
# ---------------------------------------------------------------------------
def pe_sym_kernel(x_ref, w_ref, b_ref, o_ref):
    acc = jnp.dot(x_ref[...], w_ref[...], preferred_element_type=jnp.float32)
    o_ref[...] = (acc + b_ref[...]).astype(o_ref.dtype)


# ---------------------------------------------------------------------------
# One-time fused-parameter build (cache across forward calls).
# ---------------------------------------------------------------------------
def build_fused_params(params, n_agents, *, pos=False, compute_dtype=jnp.float32):
    w_ind = params["individual.weight"]   # (ind_dim, in_dim)
    b_ind = params["individual.bias"]     # (ind_dim,)
    w_pool = params["pooling.weight"]     # (pool_dim, in_dim)
    if pos:  # softplus weight parametrization, applied at (re)build time
        w_ind = jax.nn.softplus(w_ind)
        w_pool = jax.nn.softplus(w_pool)

    ind_dim, in_dim = w_ind.shape
    pool_dim = w_pool.shape[0]
    out_dim = ind_dim + pool_dim
    n = n_agents

    wi_t = w_ind.T.astype(jnp.float32)    # (in_dim, ind_dim)
    wp_t = w_pool.T.astype(jnp.float32)   # (in_dim, pool_dim)
    # Individual part: block diagonal (agent j only feeds its own ind slots).
    ind_block = jnp.kron(jnp.eye(n, dtype=jnp.float32), wi_t)            # (n*in, n*ind)
    # Pooled part: every (j, a) block is W_pool^T / n (agent mean folded in).
    pool_block = jnp.kron(jnp.full((n, n), 1.0 / n, jnp.float32), wp_t)  # (n*in, n*pool)
    big_w = jnp.concatenate(
        [ind_block.reshape(n * in_dim, n, ind_dim),
         pool_block.reshape(n * in_dim, n, pool_dim)], axis=-1,
    ).reshape(n * in_dim, n * out_dim)
    big_b = jnp.tile(
        jnp.concatenate([b_ind.astype(jnp.float32),
                         jnp.zeros((pool_dim,), jnp.float32)]), n,
    ).reshape(1, n * out_dim)

    # Lane-dense padding (done once here): last dims -> multiple of 128.
    k, np_ = n * in_dim, n * out_dim
    k_pad, np_pad = _round_up(k, 128), _round_up(np_, 128)
    if (k_pad, np_pad) != (k, np_):
        big_w = jnp.pad(big_w, ((0, k_pad - k), (0, np_pad - np_)))
        big_b = jnp.pad(big_b, ((0, 0), (0, np_pad - np_)))

    return {
        "big_w": big_w.astype(compute_dtype),
        "big_b": big_b,                         # bias add stays f32
        "n": n, "in_dim": in_dim, "out_dim": out_dim,
        "k": k, "np": np_, "k_pad": k_pad, "np_pad": np_pad,
    }


def _run_fused(x_lane, big_w, big_b, *, out_dtype, tb, grid_b, k_pad, np_pad,
               vmem_limit, single_buffer_weights):
    if single_buffer_weights:
        # Constant index_map -> one fetch suffices; halves weight VMEM cost.
        w_spec = pl.BlockSpec((k_pad, np_pad), lambda i: (0, 0),
                              pipeline_mode=pl.Buffered(1))
        b_spec = pl.BlockSpec((1, np_pad), lambda i: (0, 0),
                              pipeline_mode=pl.Buffered(1))
    else:
        w_spec = pl.BlockSpec((k_pad, np_pad), lambda i: (0, 0))
        b_spec = pl.BlockSpec((1, np_pad), lambda i: (0, 0))

    b_rows = x_lane.shape[0]
    return pl.pallas_call(
        pe_sym_kernel,
        out_shape=jax.ShapeDtypeStruct((b_rows, np_pad), out_dtype),
        grid_spec=pltpu.PrefetchScalarGridSpec(
            num_scalar_prefetch=0,
            grid=(grid_b,),
            in_specs=[pl.BlockSpec((tb, k_pad), lambda i: (i, 0)),
                      w_spec, b_spec],
            out_specs=pl.BlockSpec((tb, np_pad), lambda i: (i, 0)),
        ),
        compiler_params=pltpu.CompilerParams(
            dimension_semantics=("parallel",),
            vmem_limit_bytes=vmem_limit),
    )(x_lane, big_w, big_b)


# ---------------------------------------------------------------------------
# Forward wrapper
# ---------------------------------------------------------------------------
def pe_symmetry_mean_divided(x, fused, *, block_b=2048):
    """x: (..., N, in_dim) -> (..., N, out_dim). Matches PyTorch forward."""
    n, in_dim, out_dim = fused["n"], fused["in_dim"], fused["out_dim"]
    k, np_ = fused["k"], fused["np"]
    k_pad, np_pad = fused["k_pad"], fused["np_pad"]
    big_w, big_b = fused["big_w"], fused["big_b"]
    assert x.shape[-2:] == (n, in_dim)

    lead_shape = x.shape[:-2]
    x_lane = x.reshape(-1, k).astype(big_w.dtype)
    if k_pad != k:
        x_lane = jnp.pad(x_lane, ((0, 0), (0, k_pad - k)))
    b = x_lane.shape[0]

    # Sublane multiple for the batch tile (f32 -> 8, bf16 -> 16, 8-bit -> 32).
    mult = max(8, 32 // big_w.dtype.itemsize)
    if b <= mult:
        tb = b                                    # full-dim block, no masking
    else:
        # >= 2 grid steps so both v7x TensorCores get work; last block near full.
        n_steps = max(2, pl.cdiv(b, block_b))
        tb = min(block_b, _round_up(pl.cdiv(b, n_steps), mult))
    grid_b = pl.cdiv(b, tb)

    w_bytes = big_w.dtype.itemsize
    o_bytes = x.dtype.itemsize
    vmem_limit = int(min(max(
        2 * tb * k_pad * w_bytes            # double-buffered x tiles
        + 2 * tb * np_pad * o_bytes         # double-buffered out tiles
        + k_pad * np_pad * w_bytes          # fused weight
        + 2 * np_pad * 4                    # bias
        + (2 << 20),                        # slack
        16 << 20), 64 << 20))

    kwargs = dict(out_dtype=x.dtype, tb=tb, grid_b=grid_b, k_pad=k_pad,
                  np_pad=np_pad, vmem_limit=vmem_limit)
    try:
        out = _run_fused(x_lane, big_w, big_b, single_buffer_weights=True, **kwargs)
    except Exception:  # pipeline_mode unsupported -> default double-buffering
        out = _run_fused(x_lane, big_w, big_b, single_buffer_weights=False, **kwargs)

    if np_pad != np_:
        out = out[:, :np_]
    return out.reshape(*lead_shape, n, out_dim)


# ---------------------------------------------------------------------------
# Pure-JAX reference (mirrors the PyTorch forward exactly).
# ---------------------------------------------------------------------------
def pe_symmetry_mean_divided_ref(x, params, *, pos=False):
    w_ind = params["individual.weight"]
    b_ind = params["individual.bias"]
    w_pool = params["pooling.weight"]
    if pos:
        w_ind = jax.nn.softplus(w_ind)
        w_pool = jax.nn.softplus(w_pool)
    x_mean = x.mean(-2, keepdims=True)
    pooled = x_mean @ w_pool.T                               # (.., 1, pool_dim)
    pooled = jnp.broadcast_to(pooled, x.shape[:-1] + (w_pool.shape[0],))
    ind = x @ w_ind.T + b_ind                                # (.., N, ind_dim)
    return jnp.concatenate([ind, pooled], axis=-1)


def init_params(key, in_dim, out_dim):
    """nn.Linear-style init: U(-1/sqrt(in_dim), 1/sqrt(in_dim))."""
    ind_dim, pool_dim = _split_dims(in_dim, out_dim)
    bound = 1.0 / (in_dim ** 0.5)
    ks = jax.random.split(key, 3)
    u = lambda k, shape: jax.random.uniform(k, shape, jnp.float32, -bound, bound)
    return {
        "individual.weight": u(ks[0], (ind_dim, in_dim)),
        "individual.bias": u(ks[1], (ind_dim,)),
        "pooling.weight": u(ks[2], (pool_dim, in_dim)),
    }


if __name__ == "__main__":
    key = jax.random.PRNGKey(0)
    kp, kx, kp2, kx2 = jax.random.split(key, 4)

    # --- Config 1: lane-aligned (N*in_dim=128, N*out_dim=256), pos=False/True.
    in_dim, out_dim, n_agents, batch = 16, 32, 8, 4
    params = init_params(kp, in_dim, out_dim)
    x = jax.random.normal(kx, (batch, n_agents, in_dim), jnp.float32)

    fused = build_fused_params(params, n_agents, pos=False)   # built once, reused
    out = jax.block_until_ready(pe_symmetry_mean_divided(x, fused))
    ref = pe_symmetry_mean_divided_ref(x, params, pos=False)
    assert out.shape == (batch, n_agents, out_dim)
    if not jnp.allclose(out, ref, rtol=1e-4, atol=1e-5):
        raise AssertionError("Pallas kernel (pos=False) does not match JAX reference")

    fused_pos = build_fused_params(params, n_agents, pos=True)
    out_p = jax.block_until_ready(pe_symmetry_mean_divided(x, fused_pos))
    ref_p = pe_symmetry_mean_divided_ref(x, params, pos=True)
    if not jnp.allclose(out_p, ref_p, rtol=1e-4, atol=1e-5):
        raise AssertionError("Pallas kernel (pos=True) does not match JAX reference")

    # --- Config 2: misaligned lanes + multi-step grid with a partial last block.
    in_dim2, out_dim2, n_agents2, batch2 = 5, 7, 3, 37
    params2 = init_params(kp2, in_dim2, out_dim2)
    x2 = jax.random.normal(kx2, (batch2, n_agents2, in_dim2), jnp.float32)
    fused2 = build_fused_params(params2, n_agents2)
    out2 = jax.block_until_ready(pe_symmetry_mean_divided(x2, fused2, block_b=16))
    ref2 = pe_symmetry_mean_divided_ref(x2, params2)
    if out2.shape != (batch2, n_agents2, out_dim2):
        raise AssertionError("bad output shape for misaligned config")
    if not jnp.allclose(out2, ref2, rtol=1e-4, atol=1e-5):
        raise AssertionError("Pallas kernel (misaligned config) does not match JAX reference")

    print("KERNEL_OK")
</pallas_src>

<mosaic_0001>
module attributes {stable_mosaic.version = 11 : i64} {
  func.func @pe_sym_kernel(%arg0: i32, %arg1: memref<4x128xf32, #tpu.memory_space<vmem>>, %arg2: memref<128x256xf32, #tpu.memory_space<vmem>>, %arg3: memref<1x256xf32, #tpu.memory_space<vmem>>, %arg4: memref<4x256xf32, #tpu.memory_space<vmem>>) attributes {dimension_semantics = [#tpu.dimension_semantics<parallel>], iteration_bounds = array<i64: 1>, scalar_prefetch = 0 : i64, scratch_operands = 0 : i64, tpu.core_type = #tpu.core_type<tc>, window_params = [{transform_indices = @transform_0, window_bounds = array<i64: 4, 128>}, {pipeline_mode = #tpu.pipeline_mode<synchronous>, transform_indices = @transform_1, window_bounds = array<i64: 128, 256>}, {pipeline_mode = #tpu.pipeline_mode<synchronous>, transform_indices = @transform_2, window_bounds = array<i64: 1, 256>}, {transform_indices = @transform_3, window_bounds = array<i64: 4, 256>}]} {
    %c0 = arith.constant 0 : index
    %c0_0 = arith.constant 0 : index
    %0 = vector.load %arg1[%c0, %c0_0] : memref<4x128xf32, #tpu.memory_space<vmem>>, vector<4x128xf32>
    %c0_1 = arith.constant 0 : index
    %c0_2 = arith.constant 0 : index
    %1 = vector.load %arg2[%c0_1, %c0_2] : memref<128x256xf32, #tpu.memory_space<vmem>>, vector<128x256xf32>
    %cst = arith.constant dense<0.000000e+00> : vector<4x256xf32>
    %2 = tpu.matmul %0, %1, %cst {dimension_numbers = #tpu.dot_dimension_numbers<[1], [0], [0], [1], [0, 0, 1, 1], [], []>} : vector<4x128xf32>, vector<128x256xf32>, vector<4x256xf32> -> vector<4x256xf32>
    %c0_3 = arith.constant 0 : index
    %c0_4 = arith.constant 0 : index
    %3 = vector.load %arg3[%c0_3, %c0_4] : memref<1x256xf32, #tpu.memory_space<vmem>>, vector<1x256xf32>
    %4 = vector.broadcast %3 : vector<1x256xf32> to vector<4x256xf32>
    %5 = arith.addf %2, %4 : vector<4x256xf32>
    %c0_5 = arith.constant 0 : index
    %c0_6 = arith.constant 0 : index
    %6 = vector.load %arg4[%c0_5, %c0_6] : memref<4x256xf32, #tpu.memory_space<vmem>>, vector<4x256xf32>
    tpu.vector_store %arg4[%c0_5, %c0_6], %5 {strides = array<i32>} : memref<4x256xf32, #tpu.memory_space<vmem>>, vector<4x256xf32>,
    return
  }
  func.func @transform_0(%arg0: i32) -> (i32, i32) {
    %c0_i32 = arith.constant 0 : i32
    %c0_i32_0 = arith.constant 0 : i32
    return %arg0, %c0_i32 : i32, i32
  }
  func.func @transform_1(%arg0: i32) -> (i32, i32) {
    %c0_i32 = arith.constant 0 : i32
    %c0_i32_0 = arith.constant 0 : i32
    %c0_i32_1 = arith.constant 0 : i32
    return %c0_i32, %c0_i32_0 : i32, i32
  }
  func.func @transform_2(%arg0: i32) -> (i32, i32) {
    %c0_i32 = arith.constant 0 : i32
    %c0_i32_0 = arith.constant 0 : i32
    %c0_i32_1 = arith.constant 0 : i32
    return %c0_i32, %c0_i32_0 : i32, i32
  }
  func.func @transform_3(%arg0: i32) -> (i32, i32) {
    %c0_i32 = arith.constant 0 : i32
    %c0_i32_0 = arith.constant 0 : i32
    return %arg0, %c0_i32 : i32, i32
  }
}

module attributes {stable_mosaic.version = 11 : i64} {
  func.func @pe_sym_kernel(%arg0: i32, %arg1: memref<4x128xf32, #tpu.memory_space<vmem>>, %arg2: memref<128x256xf32, #tpu.memory_space<vmem>>, %arg3: memref<1x256xf32, #tpu.memory_space<vmem>>, %arg4: memref<4x256xf32, #tpu.memory_space<vmem>>) attributes {dimension_semantics = [#tpu.dimension_semantics<parallel>], iteration_bounds = array<i64: 1>, scalar_prefetch = 0 : i64, scratch_operands = 0 : i64, tpu.core_type = #tpu.core_type<tc>, window_params = [{transform_indices = @transform_0, window_bounds = array<i64: 4, 128>}, {pipeline_mode = #tpu.pipeline_mode<synchronous>, transform_indices = @transform_1, window_bounds = array<i64: 128, 256>}, {pipeline_mode = #tpu.pipeline_mode<synchronous>, transform_indices = @transform_2, window_bounds = array<i64: 1, 256>}, {transform_indices = @transform_3, window_bounds = array<i64: 4, 256>}]} {
    %c0 = arith.constant 0 : index
    %c0_0 = arith.constant 0 : index
    %0 = vector.load %arg1[%c0, %c0_0] : memref<4x128xf32, #tpu.memory_space<vmem>>, vector<4x128xf32>
    %c0_1 = arith.constant 0 : index
    %c0_2 = arith.constant 0 : index
    %1 = vector.load %arg2[%c0_1, %c0_2] : memref<128x256xf32, #tpu.memory_space<vmem>>, vector<128x256xf32>
    %cst = arith.constant dense<0.000000e+00> : vector<4x256xf32>
    %2 = tpu.matmul %0, %1, %cst {dimension_numbers = #tpu.dot_dimension_numbers<[1], [0], [0], [1], [0, 0, 1, 1], [], []>} : vector<4x128xf32>, vector<128x256xf32>, vector<4x256xf32> -> vector<4x256xf32>
    %c0_3 = arith.constant 0 : index
    %c0_4 = arith.constant 0 : index
    %3 = vector.load %arg3[%c0_3, %c0_4] : memref<1x256xf32, #tpu.memory_space<vmem>>, vector<1x256xf32>
    %4 = vector.broadcast %3 : vector<1x256xf32> to vector<4x256xf32>
    %5 = arith.addf %2, %4 : vector<4x256xf32>
    %c0_5 = arith.constant 0 : index
    %c0_6 = arith.constant 0 : index
    %6 = vector.load %arg4[%c0_5, %c0_6] : memref<4x256xf32, #tpu.memory_space<vmem>>, vector<4x256xf32>
    tpu.vector_store %arg4[%c0_5, %c0_6], %5 {strides = array<i32>} : memref<4x256xf32, #tpu.memory_space<vmem>>, vector<4x256xf32>,
    return
  }
  func.func @transform_0(%arg0: i32) -> (i32, i32) {
    %c0_i32 = arith.constant 0 : i32
    %c0_i32_0 = arith.constant 0 : i32
    return %arg0, %c0_i32 : i32, i32
  }
  func.func @transform_1(%arg0: i32) -> (i32, i32) {
    %c0_i32 = arith.constant 0 : i32
    %c0_i32_0 = arith.constant 0 : i32
    %c0_i32_1 = arith.constant 0 : i32
    return %c0_i32, %c0_i32_0 : i32, i32
  }
  func.func @transform_2(%arg0: i32) -> (i32, i32) {
    %c0_i32 = arith.constant 0 : i32
    %c0_i32_0 = arith.constant 0 : i32
    %c0_i32_1 = arith.constant 0 : i32
    return %c0_i32, %c0_i32_0 : i32, i32
  }
  func.func @transform_3(%arg0: i32) -> (i32, i32) {
    %c0_i32 = arith.constant 0 : i32
    %c0_i32_0 = arith.constant 0 : i32
    return %arg0, %c0_i32 : i32, i32
  }
}

</mosaic_0001>

<bundles_post_ra>
// kernel: tpu_custom_call.1
= control target key start
LH: loop header
LB: loop body
LE: loop exit
PB: predicated region body
PF: predicated region fallthrough
CT: control target
= control target key end

     0   :  { %8 = vsyncpa [#allocation3], 0  ;;  %s308_s0 = inlined_call_operand.hbm [shape: f32[4,128], index: 0, kind: input, shape index: {}]   ;;  %s309_s1 = inlined_call_operand.hbm [shape: f32[128,256], index: 1, kind: input, shape index: {}]   ;;  %s310_s2 = inlined_call_operand.hbm [shape: f32[1,256], index: 2, kind: input, shape index: {}]   ;;  %s311_s3 = inlined_call_operand.hbm [shape: f32[4,256], index: 3, kind: output, shape index: {}]  }
   0x1   :  { %9 = vsyncpa [#allocation6], 0  ;;  %s26_s14 = sshll.u32 %s309_s1, 4  ;;  %s27_s14 = int_to_ptr.hbm [resolvable:$true] %s26_s14 }
   0x2   :  { %10 = vsyncpa [#allocation4], 0  ;;  %s270_s15 = smov [#allocation5]   ;;  %s16_s19 = sshll.u32 %s308_s0, 4  ;;  %s17_s19 = int_to_ptr.hbm [resolvable:$true] %s16_s19 }
   0x3   :  { %s28_s16 = sshll.u32 %s270_s15, 4  ;;  %s271_s20 = smov 256   ;;  %s29_s16 = int_to_ptr.vmem [resolvable:$true] %s28_s16 }
   0x4   :  { %s272_s21 = smov 16   ;;  %s273_s22 = smov [#allocation2]  }
   0x5   :  { %34 = dma.hbm_to_vmem [thread:$0]  %s27_s14, 4096, %s29_s16, [#allocation6], %s271_s20, %s271_s20, %s272_s21  }
   0x6   :  { %s18_s23 = sshll.u32 %s273_s22, 4  ;;  %s40_s26 = sshll.u32 %s310_s2, 4  ;;  %s19_s23 = int_to_ptr.vmem [resolvable:$true] %s18_s23  ;;  %s41_s26 = int_to_ptr.hbm [resolvable:$true] %s40_s26 }
   0x7   :  { %21 = dma.hbm_to_vmem [thread:$0]  %s17_s19, 64, %s19_s23, [#allocation3]  }
   0x8   :  { %s274_s1 = smov [#allocation7]  }
   0x9   :  { %s42_s27 = sshll.u32 %s274_s1, 4  ;;  %s43_s27 = int_to_ptr.vmem [resolvable:$true] %s42_s27 }
   0xa   :  { %45 = dma.hbm_to_vmem [thread:$0]  %s41_s26, 32, %s43_s27, [#allocation6]  }
   0xb   :  { %264 = dma.done.wait [#allocation3], 64  }
   0xc   :  { %265 = vsyncadd [#allocation3], 4294967232 }
   0xd   :  { %266 = dma.done.wait [#allocation6], 4128  }
   0xe   :  { %267 = vsyncadd [#allocation6], 4294963168  ;;  %v90_v0 = vld [vmem:[#allocation5 + $0xf8] sm:$0xff]  ;;  %v89_v1 = vld [vmem:[#allocation5 + $0xf0] sm:$0xff]  ;;  %s275_s0 = smov [#allocation8]   ;;  %s151_s30 = sshll.u32 %s311_s3, 4  ;;  %s152_s30 = int_to_ptr.hbm [resolvable:$true] %s151_s30 }
   0xf   :  { %v88_v2 = vld [vmem:[#allocation5 + $0xe8] sm:$0xff]  ;;  %117 = vmatpush.msra.mxu1 %v90_v0  ;;  %97 = vmatpush.msra.mxu0 %v89_v1  ;;  %v87_v3 = vld [vmem:[#allocation5 + $0xe0] sm:$0xff]  ;;  %v86_v4 = vld [vmem:[#allocation5 + $0xd8] sm:$0xff]  ;;  %s149_s2 = sshll.u32 %s275_s0, 4  ;;  %vm140_vm0 = vcmask 1043456   ;;  %s150_s2 = int_to_ptr.vmem [resolvable:$true] %s149_s2 }
  0x10   :  { %v85_v5 = vld [vmem:[#allocation5 + $0xd0] sm:$0xff]  ;;  %v84_v6 = vld [vmem:[#allocation5 + $0xc8] sm:$0xff]  ;;  %v83_v7 = vld [vmem:[#allocation5 + $0xc0] sm:$0xff] }
  0x11   :  { %118 = vmatpush.msra.mxu1 %v88_v2  ;;  %98 = vmatpush.msra.mxu0 %v87_v3  ;;  %v82_v8 = vld [vmem:[#allocation5 + $0xb8] sm:$0xff]  ;;  %v81_v9 = vld [vmem:[#allocation5 + $0xb0] sm:$0xff]  ;;  %v80_v10 = vld [vmem:[#allocation5 + $0xa8] sm:$0xff] }
  0x12   :  { %v79_v11 = vld [vmem:[#allocation5 + $0xa0] sm:$0xff]  ;;  %v78_v12 = vld [vmem:[#allocation5 + $0x98] sm:$0xff]  ;;  %v77_v13 = vld [vmem:[#allocation5 + $0x90] sm:$0xff] }
  0x13   :  { %119 = vmatpush.msra.mxu1 %v86_v4  ;;  %99 = vmatpush.msra.mxu0 %v85_v5  ;;  %v76_v14 = vld [vmem:[#allocation5 + $0x88] sm:$0xff]  ;;  %v75_v15 = vld [vmem:[#allocation5 + $0x80] sm:$0xff]  ;;  %v74_v16 = vld [vmem:[#allocation5 + $0x78] sm:$0xff] }
  0x14   :  { %v73_v17 = vld [vmem:[#allocation5 + $0x70] sm:$0xff]  ;;  %v72_v18 = vld [vmem:[#allocation5 + $0x68] sm:$0xff]  ;;  %v71_v19 = vld [vmem:[#allocation5 + $0x60] sm:$0xff] }
  0x15   :  { %120 = vmatpush.msra.mxu1 %v84_v6  ;;  %100 = vmatpush.msra.mxu0 %v83_v7  ;;  %v70_v20 = vld [vmem:[#allocation5 + $0x58] sm:$0xff]  ;;  %v69_v21 = vld [vmem:[#allocation5 + $0x50] sm:$0xff]  ;;  %v68_v22 = vld [vmem:[#allocation5 + $0x48] sm:$0xff] }
  0x16   :  { %v67_v23 = vld [vmem:[#allocation5 + $0x40] sm:$0xff]  ;;  %v66_v24 = vld [vmem:[#allocation5 + $0x38] sm:$0xff]  ;;  %v65_v25 = vld [vmem:[#allocation5 + $0x30] sm:$0xff] }
  0x17   :  { %121 = vmatpush.msra.mxu1 %v82_v8  ;;  %101 = vmatpush.msra.mxu0 %v81_v9  ;;  %v64_v26 = vld [vmem:[#allocation5 + $0x28] sm:$0xff]  ;;  %v63_v27 = vld [vmem:[#allocation5 + $0x20] sm:$0xff]  ;;  %v62_v28 = vld [vmem:[#allocation5 + $0x18] sm:$0xff] }
  0x18   :  { %v61_v29 = vld [vmem:[#allocation5 + $0x10] sm:$0xff]  ;;  %v60_v30 = vld [vmem:[#allocation5 + $0x8] sm:$0xff]  ;;  %v59_v31 = vld [vmem:[#allocation5] sm:$0xff] }
  0x19   :  { %122 = vmatpush.msra.mxu1 %v80_v10  ;;  %102 = vmatpush.msra.mxu0 %v79_v11  ;;  %v58_v32 = vld [vmem:[#allocation2] sm:$0xf]  ;;  %v91_v33 = vld [vmem:[#allocation7] sm:$0x3] }
  0x1a   :  { %v94_v34 = vperm.slane %v91_v33, 1  ;;  %v93_v35 = vperm.slane %v91_v33, 0 }
  0x1b   :  { %123 = vmatpush.msra.mxu1 %v78_v12  ;;  %103 = vmatpush.msra.mxu0 %v77_v13 }
  0x1d   :  { %124 = vmatpush.msra.mxu1 %v76_v14  ;;  %104 = vmatpush.msra.mxu0 %v75_v15 }
  0x1f   :  { %125 = vmatpush.msra.mxu1 %v74_v16  ;;  %105 = vmatpush.msra.mxu0 %v73_v17 }
  0x21   :  { %126 = vmatpush.msra.mxu1 %v72_v18  ;;  %106 = vmatpush.msra.mxu0 %v71_v19 }
  0x23   :  { %127 = vmatpush.msra.mxu1 %v70_v20  ;;  %107 = vmatpush.msra.mxu0 %v69_v21 }
  0x25   :  { %128 = vmatpush.msra.mxu1 %v68_v22  ;;  %108 = vmatpush.msra.mxu0 %v67_v23 }
  0x27   :  { %129 = vmatpush.msra.mxu1 %v66_v24  ;;  %109 = vmatpush.msra.mxu0 %v65_v25 }
  0x29   :  { %130 = vmatpush.msra.mxu1 %v64_v26  ;;  %110 = vmatpush.msra.mxu0 %v63_v27 }
  0x2b   :  { %131 = vmatpush.msra.mxu1 %v62_v28  ;;  %111 = vmatpush.msra.mxu0 %v61_v29 }
  0x2d   :  { %132 = vmatpush.msra.mxu1 %v60_v30  ;;  %112 = vmatpush.msra.mxu0 %v59_v31 }
  0x2e   :  { %133 = vmatmul.f32.vlgmr.msra.gmra.mxu1 %v58_v32  ;;  %113 = vmatmul.f32.vlgmr.msra.gmra.mxu0 %v58_v32 }
  0xab   :  { %v134_v36 = vpop.f32.mrf.mxu1  ;;  %v114_v37 = vpop.f32.mrf.mxu0 }
  0xac   :  { %v135_v38 = vadd.f32 %v134_v36, %v94_v34  ;;  %v115_v39 = vadd.f32 %v114_v37, %v93_v35 }
  0xae   :  { %v139_v40 = vrot.slane %v135_v38, 4 }
  0xb0   :  { %v141_v41 = vsel %vm140_vm0, %v115_v39, %v139_v40 }
  0xb1   :  { %143 = vst [vmem:[#allocation8] sm:$0xff] %v141_v41 }
  0xb2   :  { %154 = dma.vmem_to_hbm [thread:$0]  %s150_s2, 128, %s152_s30, [#allocation4]  }
  0xb3   :  { %268 = dma.done.wait [#allocation4], 128  }
  0xb4   :  { %269 = vsyncadd [#allocation4], 4294967168 }
  0xb5   :  { %159 = vsyncpa [#allocation3], 1 }
  0xb6   :  { %160 = vsyncpa [#allocation6], 1 }
  0xb7   :  { %161 = vsyncpa [#allocation4], 1 }

// kernel: tpu_custom_call.1
= control target key start
LH: loop header
LB: loop body
LE: loop exit
PB: predicated region body
PF: predicated region fallthrough
CT: control target
= control target key end

     0   :  { %8 = vsyncpa [#allocation3], 0  ;;  %s308_s0 = inlined_call_operand.hbm [shape: f32[4,128], index: 0, kind: input, shape index: {}]   ;;  %s309_s1 = inlined_call_operand.hbm [shape: f32[128,256], index: 1, kind: input, shape index: {}]   ;;  %s310_s2 = inlined_call_operand.hbm [shape: f32[1,256], index: 2, kind: input, shape index: {}]   ;;  %s311_s3 = inlined_call_operand.hbm [shape: f32[4,256], index: 3, kind: output, shape index: {}]  }
   0x1   :  { %9 = vsyncpa [#allocation6], 0  ;;  %s26_s14 = sshll.u32 %s309_s1, 4  ;;  %s27_s14 = int_to_ptr.hbm [resolvable:$true] %s26_s14 }
   0x2   :  { %10 = vsyncpa [#allocation4], 0  ;;  %s270_s15 = smov [#allocation5]   ;;  %s16_s19 = sshll.u32 %s308_s0, 4  ;;  %s17_s19 = int_to_ptr.hbm [resolvable:$true] %s16_s19 }
   0x3   :  { %s28_s16 = sshll.u32 %s270_s15, 4  ;;  %s271_s20 = smov 256   ;;  %s29_s16 = int_to_ptr.vmem [resolvable:$true] %s28_s16 }
   0x4   :  { %s272_s21 = smov 16   ;;  %s273_s22 = smov [#allocation2]  }
   0x5   :  { %34 = dma.hbm_to_vmem [thread:$0]  %s27_s14, 4096, %s29_s16, [#allocation6], %s271_s20, %s271_s20, %s272_s21  }
   0x6   :  { %s18_s23 = sshll.u32 %s273_s22, 4  ;;  %s40_s26 = sshll.u32 %s310_s2, 4  ;;  %s19_s23 = int_to_ptr.vmem [resolvable:$true] %s18_s23  ;;  %s41_s26 = int_to_ptr.hbm [resolvable:$true] %s40_s26 }
   0x7   :  { %21 = dma.hbm_to_vmem [thread:$0]  %s17_s19, 64, %s19_s23, [#allocation3]  }
   0x8   :  { %s274_s1 = smov [#allocation7]  }
   0x9   :  { %s42_s27 = sshll.u32 %s274_s1, 4  ;;  %s43_s27 = int_to_ptr.vmem [resolvable:$true] %s42_s27 }
   0xa   :  { %45 = dma.hbm_to_vmem [thread:$0]  %s41_s26, 32, %s43_s27, [#allocation6]  }
   0xb   :  { %264 = dma.done.wait [#allocation3], 64  }
   0xc   :  { %265 = vsyncadd [#allocation3], 4294967232 }
   0xd   :  { %266 = dma.done.wait [#allocation6], 4128  }
   0xe   :  { %267 = vsyncadd [#allocation6], 4294963168  ;;  %v90_v0 = vld [vmem:[#allocation5 + $0xf8] sm:$0xff]  ;;  %v89_v1 = vld [vmem:[#allocation5 + $0xf0] sm:$0xff]  ;;  %s275_s0 = smov [#allocation8]   ;;  %s151_s30 = sshll.u32 %s311_s3, 4  ;;  %s152_s30 = int_to_ptr.hbm [resolvable:$true] %s151_s30 }
   0xf   :  { %v88_v2 = vld [vmem:[#allocation5 + $0xe8] sm:$0xff]  ;;  %117 = vmatpush.msra.mxu1 %v90_v0  ;;  %97 = vmatpush.msra.mxu0 %v89_v1  ;;  %v87_v3 = vld [vmem:[#allocation5 + $0xe0] sm:$0xff]  ;;  %v86_v4 = vld [vmem:[#allocation5 + $0xd8] sm:$0xff]  ;;  %s149_s2 = sshll.u32 %s275_s0, 4  ;;  %vm140_vm0 = vcmask 1043456   ;;  %s150_s2 = int_to_ptr.vmem [resolvable:$true] %s149_s2 }
  0x10   :  { %v85_v5 = vld [vmem:[#allocation5 + $0xd0] sm:$0xff]  ;;  %v84_v6 = vld [vmem:[#allocation5 + $0xc8] sm:$0xff]  ;;  %v83_v7 = vld [vmem:[#allocation5 + $0xc0] sm:$0xff] }
  0x11   :  { %118 = vmatpush.msra.mxu1 %v88_v2  ;;  %98 = vmatpush.msra.mxu0 %v87_v3  ;;  %v82_v8 = vld [vmem:[#allocation5 + $0xb8] sm:$0xff]  ;;  %v81_v9 = vld [vmem:[#allocation5 + $0xb0] sm:$0xff]  ;;  %v80_v10 = vld [vmem:[#allocation5 + $0xa8] sm:$0xff] }
  0x12   :  { %v79_v11 = vld [vmem:[#allocation5 + $0xa0] sm:$0xff]  ;;  %v78_v12 = vld [vmem:[#allocation5 + $0x98] sm:$0xff]  ;;  %v77_v13 = vld [vmem:[#allocation5 + $0x90] sm:$0xff] }
  0x13   :  { %119 = vmatpush.msra.mxu1 %v86_v4  ;;  %99 = vmatpush.msra.mxu0 %v85_v5  ;;  %v76_v14 = vld [vmem:[#allocation5 + $0x88] sm:$0xff]  ;;  %v75_v15 = vld [vmem:[#allocation5 + $0x80] sm:$0xff]  ;;  %v74_v16 = vld [vmem:[#allocation5 + $0x78] sm:$0xff] }
  0x14   :  { %v73_v17 = vld [vmem:[#allocation5 + $0x70] sm:$0xff]  ;;  %v72_v18 = vld [vmem:[#allocation5 + $0x68] sm:$0xff]  ;;  %v71_v19 = vld [vmem:[#allocation5 + $0x60] sm:$0xff] }
  0x15   :  { %120 = vmatpush.msra.mxu1 %v84_v6  ;;  %100 = vmatpush.msra.mxu0 %v83_v7  ;;  %v70_v20 = vld [vmem:[#allocation5 + $0x58] sm:$0xff]  ;;  %v69_v21 = vld [vmem:[#allocation5 + $0x50] sm:$0xff]  ;;  %v68_v22 = vld [vmem:[#allocation5 + $0x48] sm:$0xff] }
  0x16   :  { %v67_v23 = vld [vmem:[#allocation5 + $0x40] sm:$0xff]  ;;  %v66_v24 = vld [vmem:[#allocation5 + $0x38] sm:$0xff]  ;;  %v65_v25 = vld [vmem:[#allocation5 + $0x30] sm:$0xff] }
  0x17   :  { %121 = vmatpush.msra.mxu1 %v82_v8  ;;  %101 = vmatpush.msra.mxu0 %v81_v9  ;;  %v64_v26 = vld [vmem:[#allocation5 + $0x28] sm:$0xff]  ;;  %v63_v27 = vld [vmem:[#allocation5 + $0x20] sm:$0xff]  ;;  %v62_v28 = vld [vmem:[#allocation5 + $0x18] sm:$0xff] }
  0x18   :  { %v61_v29 = vld [vmem:[#allocation5 + $0x10] sm:$0xff]  ;;  %v60_v30 = vld [vmem:[#allocation5 + $0x8] sm:$0xff]  ;;  %v59_v31 = vld [vmem:[#allocation5] sm:$0xff] }
  0x19   :  { %122 = vmatpush.msra.mxu1 %v80_v10  ;;  %102 = vmatpush.msra.mxu0 %v79_v11  ;;  %v58_v32 = vld [vmem:[#allocation2] sm:$0xf]  ;;  %v91_v33 = vld [vmem:[#allocation7] sm:$0x3] }
  0x1a   :  { %v94_v34 = vperm.slane %v91_v33, 1  ;;  %v93_v35 = vperm.slane %v91_v33, 0 }
  0x1b   :  { %123 = vmatpush.msra.mxu1 %v78_v12  ;;  %103 = vmatpush.msra.mxu0 %v77_v13 }
  0x1d   :  { %124 = vmatpush.msra.mxu1 %v76_v14  ;;  %104 = vmatpush.msra.mxu0 %v75_v15 }
  0x1f   :  { %125 = vmatpush.msra.mxu1 %v74_v16  ;;  %105 = vmatpush.msra.mxu0 %v73_v17 }
  0x21   :  { %126 = vmatpush.msra.mxu1 %v72_v18  ;;  %106 = vmatpush.msra.mxu0 %v71_v19 }
  0x23   :  { %127 = vmatpush.msra.mxu1 %v70_v20  ;;  %107 = vmatpush.msra.mxu0 %v69_v21 }
  0x25   :  { %128 = vmatpush.msra.mxu1 %v68_v22  ;;  %108 = vmatpush.msra.mxu0 %v67_v23 }
  0x27   :  { %129 = vmatpush.msra.mxu1 %v66_v24  ;;  %109 = vmatpush.msra.mxu0 %v65_v25 }
  0x29   :  { %130 = vmatpush.msra.mxu1 %v64_v26  ;;  %110 = vmatpush.msra.mxu0 %v63_v27 }
  0x2b   :  { %131 = vmatpush.msra.mxu1 %v62_v28  ;;  %111 = vmatpush.msra.mxu0 %v61_v29 }
  0x2d   :  { %132 = vmatpush.msra.mxu1 %v60_v30  ;;  %112 = vmatpush.msra.mxu0 %v59_v31 }
  0x2e   :  { %133 = vmatmul.f32.vlgmr.msra.gmra.mxu1 %v58_v32  ;;  %113 = vmatmul.f32.vlgmr.msra.gmra.mxu0 %v58_v32 }
  0xab   :  { %v134_v36 = vpop.f32.mrf.mxu1  ;;  %v114_v37 = vpop.f32.mrf.mxu0 }
  0xac   :  { %v135_v38 = vadd.f32 %v134_v36, %v94_v34  ;;  %v115_v39 = vadd.f32 %v114_v37, %v93_v35 }
  0xae   :  { %v139_v40 = vrot.slane %v135_v38, 4 }
  0xb0   :  { %v141_v41 = vsel %vm140_vm0, %v115_v39, %v139_v40 }
  0xb1   :  { %143 = vst [vmem:[#allocation8] sm:$0xff] %v141_v41 }
  0xb2   :  { %154 = dma.vmem_to_hbm [thread:$0]  %s150_s2, 128, %s152_s30, [#allocation4]  }
  0xb3   :  { %268 = dma.done.wait [#allocation4], 128  }
  0xb4   :  { %269 = vsyncadd [#allocation4], 4294967168 }
  0xb5   :  { %159 = vsyncpa [#allocation3], 1 }
  0xb6   :  { %160 = vsyncpa [#allocation6], 1 }
  0xb7   :  { %161 = vsyncpa [#allocation4], 1 }

</bundles_post_ra>
